<compile_context>
chip_gen: v7x
topology: tpu7x:2x2x1
jax: 0.10.0
libtpu: 0.0.40
codegen_flags: <defaults>
</compile_context>

<pallas_src>
import math
import functools

import jax
import jax.numpy as jnp
from jax import lax
from jax.experimental import pallas as pl
from jax.experimental.pallas import tpu as pltpu

# Explicit scoped-VMEM cap: raises v5e's 16 MiB default, matches v6e/v7x defaults,
# and stays well under v7x's 64 MiB physical VMEM.
_VMEM_LIMIT_BYTES = 32 * 1024 * 1024


def _row_tile(n, target=256):
    """Row tile for the projection: `target` if it divides n, else the full extent."""
    return target if n % target == 0 else n


def _seq_tile(t):
    """Query/KV tile: 256 or 128 if they divide T (MXU/vreg friendly), else full T."""
    for cand in (256, 128):
        if t % cand == 0:
            return cand
    return t


# -----------------------------------------------------------------------------
# Kernel 1: row-tiled linear layer  y = x @ W + b   (used for the fused QKV proj)
# -----------------------------------------------------------------------------
def _linear_kernel(x_ref, w_ref, b_ref, o_ref):
    o_ref[...] = (jnp.dot(x_ref[...], w_ref[...],
                          preferred_element_type=jnp.float32)
                  + b_ref[...]).astype(o_ref.dtype)


def _linear(x2d, w, b):
    rows, c_in = x2d.shape
    c_out = w.shape[1]
    tm = _row_tile(rows)
    return pl.pallas_call(
        _linear_kernel,
        out_shape=jax.ShapeDtypeStruct((rows, c_out), x2d.dtype),
        grid_spec=pltpu.PrefetchScalarGridSpec(
            num_scalar_prefetch=0,
            grid=(rows // tm,),
            in_specs=[
                pl.BlockSpec((tm, c_in), lambda i: (i, 0)),
                pl.BlockSpec((c_in, c_out), lambda i: (0, 0)),   # grid-invariant weight
                pl.BlockSpec((1, c_out), lambda i: (0, 0)),
            ],
            out_specs=pl.BlockSpec((tm, c_out), lambda i: (i, 0)),
        ),
        compiler_params=pltpu.CompilerParams(
            dimension_semantics=("parallel",),
            vmem_limit_bytes=_VMEM_LIMIT_BYTES),
    )(x2d, w, b)


# -----------------------------------------------------------------------------
# Kernel 2: flash attention (online softmax, causal block skipping) with the
#           output projection (c_proj) fused in per head.
# -----------------------------------------------------------------------------
def _flash_attn_proj_kernel(q_ref, k_ref, v_ref, wp_ref, bp_ref, o_ref,
                            m_sc, l_sc, acc_sc, proj_sc,
                            *, n_head, block_q, block_k):
    qi = pl.program_id(1)   # query block
    h = pl.program_id(2)    # head
    ki = pl.program_id(3)   # kv block (innermost)

    @pl.when((h == 0) & (ki == 0))
    def _init_out_acc():
        proj_sc[...] = jnp.zeros(proj_sc.shape, proj_sc.dtype)

    @pl.when(ki == 0)
    def _init_head():
        m_sc[...] = jnp.full(m_sc.shape, -jnp.inf, m_sc.dtype)
        l_sc[...] = jnp.zeros(l_sc.shape, l_sc.dtype)
        acc_sc[...] = jnp.zeros(acc_sc.shape, acc_sc.dtype)

    # Causal block skipping: kv blocks strictly above the diagonal do nothing.
    @pl.when(ki <= qi)
    def _process_block():
        q = q_ref[0, 0]                  # (TQ, D); 1/sqrt(D) already folded into Wq
        k = k_ref[0, 0]                  # (TK, D)
        v = v_ref[0, 0]                  # (TK, D)
        # q @ k^T without materializing a transpose: contract on the head dim.
        s = lax.dot_general(q, k, (((1,), (1,)), ((), ())),
                            preferred_element_type=jnp.float32)      # (TQ, TK)
        row = qi * block_q + lax.broadcasted_iota(jnp.int32, s.shape, 0)
        col = ki * block_k + lax.broadcasted_iota(jnp.int32, s.shape, 1)
        s = jnp.where(col > row, -jnp.inf, s)   # strict upper triangle masked

        m_prev = m_sc[...]
        m_new = jnp.maximum(m_prev, jnp.max(s, axis=-1, keepdims=True))
        alpha = jnp.exp(m_prev - m_new)
        p = jnp.exp(s - m_new)
        l_sc[...] = alpha * l_sc[...] + jnp.sum(p, axis=-1, keepdims=True)
        acc_sc[...] = alpha * acc_sc[...] + jnp.dot(
            p.astype(v.dtype), v, preferred_element_type=jnp.float32)
        m_sc[...] = m_new

    # Diagonal block == last kv block this head needs: finish softmax and fuse c_proj.
    @pl.when(ki == qi)
    def _finish_head():
        l = l_sc[...]
        inv_l = pl.reciprocal(l, approx=True)
        inv_l = inv_l * (2.0 - l * inv_l)        # one Newton step -> full f32 accuracy
        ctx = acc_sc[...] * inv_l                # (TQ, D)
        proj_sc[...] += jnp.dot(ctx.astype(wp_ref.dtype), wp_ref[...],
                                preferred_element_type=jnp.float32)   # (TQ, C)

    @pl.when((h == n_head - 1) & (ki == qi))
    def _write_output():
        o_ref[0] = (proj_sc[...] + bp_ref[...]).astype(o_ref.dtype)


def _flash_attention_proj(q, k, v, wp, bp, *, n_head):
    B, H, T, D = q.shape
    C = H * D
    block_q = block_k = _seq_tile(T)
    n_q = T // block_q
    n_k = T // block_k

    kernel = functools.partial(_flash_attn_proj_kernel, n_head=n_head,
                               block_q=block_q, block_k=block_k)

    q_spec = pl.BlockSpec((1, 1, block_q, D), lambda b, qi, h, ki: (b, h, qi, 0))
    # Clamp so fully-masked (skipped) kv blocks do not trigger a new DMA.
    kv_map = lambda b, qi, h, ki: (b, h, jnp.minimum(ki, qi), 0)
    k_spec = pl.BlockSpec((1, 1, block_k, D), kv_map)
    v_spec = pl.BlockSpec((1, 1, block_k, D), kv_map)
    wp_spec = pl.BlockSpec((D, C), lambda b, qi, h, ki: (h, 0))    # per-head row block
    bp_spec = pl.BlockSpec((1, C), lambda b, qi, h, ki: (0, 0))
    o_spec = pl.BlockSpec((1, block_q, C), lambda b, qi, h, ki: (b, qi, 0))

    return pl.pallas_call(
        kernel,
        out_shape=jax.ShapeDtypeStruct((B, T, C), q.dtype),
        grid_spec=pltpu.PrefetchScalarGridSpec(
            num_scalar_prefetch=0,
            grid=(B, n_q, n_head, n_k),
            in_specs=[q_spec, k_spec, v_spec, wp_spec, bp_spec],
            out_specs=o_spec,
            scratch_shapes=[
                pltpu.VMEM((block_q, 1), jnp.float32),   # running max  m
                pltpu.VMEM((block_q, 1), jnp.float32),   # running sum  l
                pltpu.VMEM((block_q, D), jnp.float32),   # per-head context accumulator
                pltpu.VMEM((block_q, C), jnp.float32),   # fused c_proj accumulator
            ],
        ),
        compiler_params=pltpu.CompilerParams(
            dimension_semantics=("parallel", "parallel", "arbitrary", "arbitrary"),
            vmem_limit_bytes=_VMEM_LIMIT_BYTES),
    )(q, k, v, wp, bp)


# -----------------------------------------------------------------------------
# Public wrapper
# -----------------------------------------------------------------------------
def causal_self_attention(x, params, *, n_head):
    """x: (B, T, C) float32.  params: dict of pre-transposed weights/biases."""
    B, T, C = x.shape
    assert C % n_head == 0
    D = C // n_head
    scale = 1.0 / math.sqrt(D)

    # Fused QKV weight/bias; fold the 1/sqrt(D) attention scale into the query proj.
    wqkv = jnp.concatenate(
        [params["wq"] * scale, params["wk"], params["wv"]], axis=1)   # (C, 3C)
    bqkv = jnp.concatenate(
        [params["bq"] * scale, params["bk"], params["bv"]], axis=1)   # (1, 3C)

    qkv = _linear(x.reshape(B * T, C), wqkv, bqkv)                    # (B*T, 3C)

    # Head split in plain JAX (layout plumbing outside the kernel): lane-aligned
    # (B, H, T, D) operands so the attention kernel never slices heads off a vreg
    # or concatenates them back.
    qkv = qkv.reshape(B, T, 3, n_head, D).transpose(2, 0, 3, 1, 4)    # (3, B, H, T, D)
    q, k, v = qkv[0], qkv[1], qkv[2]

    return _flash_attention_proj(q, k, v, params["wp"], params["bp"], n_head=n_head)


# -----------------------------------------------------------------------------
# Pure-JAX reference mirroring the PyTorch forward (dropout = identity)
# -----------------------------------------------------------------------------
def _reference(x, params, n_head):
    B, T, C = x.shape
    D = C // n_head
    q = x @ params["wq"] + params["bq"][0]
    k = x @ params["wk"] + params["bk"][0]
    v = x @ params["wv"] + params["bv"][0]
    q = q.reshape(B, T, n_head, D).transpose(0, 2, 1, 3)
    k = k.reshape(B, T, n_head, D).transpose(0, 2, 1, 3)
    v = v.reshape(B, T, n_head, D).transpose(0, 2, 1, 3)
    scores = jnp.einsum("bhtd,bhsd->bhts", q, k) / math.sqrt(D)
    mask = jnp.triu(jnp.full((T, T), -jnp.inf), k=1)
    scores = scores + mask[None, None]
    att = jax.nn.softmax(scores, axis=-1)
    y = jnp.einsum("bhts,bhsd->bhtd", att, v)
    y = y.transpose(0, 2, 1, 3).reshape(B, T, C)
    return y @ params["wp"] + params["bp"][0]


def _init_params(key, C):
    """Deterministic nn.Linear-style init: U(-1/sqrt(C), 1/sqrt(C))."""
    bound = 1.0 / math.sqrt(C)
    ks = jax.random.split(key, 8)

    def lin(kw, kb):
        w = jax.random.uniform(kw, (C, C), jnp.float32, -bound, bound)  # (C_in, C_out)
        b = jax.random.uniform(kb, (1, C), jnp.float32, -bound, bound)
        return w, b

    wq, bq = lin(ks[0], ks[1])
    wk, bk = lin(ks[2], ks[3])
    wv, bv = lin(ks[4], ks[5])
    wp, bp = lin(ks[6], ks[7])
    return dict(wq=wq, bq=bq, wk=wk, bk=bk, wv=wv, bv=bv, wp=wp, bp=bp)


if __name__ == "__main__":
    B, T, C, n_head = 2, 8, 32, 4   # head_dim = 8 (small test shapes)

    key = jax.random.PRNGKey(0)
    k_x, k_p = jax.random.split(key)
    x = jax.random.normal(k_x, (B, T, C), jnp.float32)
    params = _init_params(k_p, C)

    out = causal_self_attention(x, params, n_head=n_head)
    out = jax.block_until_ready(out)

    ref = _reference(x, params, n_head)
    assert out.shape == (B, T, C)
    assert jnp.allclose(out, ref, atol=1e-4, rtol=1e-4), "mismatch vs JAX reference"

    print("KERNEL_OK")
</pallas_src>

<mosaic_0001>
module attributes {stable_mosaic.version = 11 : i64} {
  func.func @_linear_kernel(%arg0: i32, %arg1: memref<16x32xf32, #tpu.memory_space<vmem>>, %arg2: memref<32x96xf32, #tpu.memory_space<vmem>>, %arg3: memref<1x96xf32, #tpu.memory_space<vmem>>, %arg4: memref<16x96xf32, #tpu.memory_space<vmem>>) attributes {dimension_semantics = [#tpu.dimension_semantics<parallel>], iteration_bounds = array<i64: 1>, scalar_prefetch = 0 : i64, scratch_operands = 0 : i64, tpu.core_type = #tpu.core_type<tc>, window_params = [{transform_indices = @transform_0, window_bounds = array<i64: 16, 32>}, {pipeline_mode = #tpu.pipeline_mode<synchronous>, transform_indices = @transform_1, window_bounds = array<i64: 32, 96>}, {pipeline_mode = #tpu.pipeline_mode<synchronous>, transform_indices = @transform_2, window_bounds = array<i64: 1, 96>}, {transform_indices = @transform_3, window_bounds = array<i64: 16, 96>}]} {
    %c0 = arith.constant 0 : index
    %c0_0 = arith.constant 0 : index
    %0 = vector.load %arg1[%c0, %c0_0] : memref<16x32xf32, #tpu.memory_space<vmem>>, vector<16x32xf32>
    %c0_1 = arith.constant 0 : index
    %c0_2 = arith.constant 0 : index
    %1 = vector.load %arg2[%c0_1, %c0_2] : memref<32x96xf32, #tpu.memory_space<vmem>>, vector<32x96xf32>
    %cst = arith.constant dense<0.000000e+00> : vector<16x96xf32>
    %2 = tpu.matmul %0, %1, %cst {dimension_numbers = #tpu.dot_dimension_numbers<[1], [0], [0], [1], [0, 0, 1, 1], [], []>} : vector<16x32xf32>, vector<32x96xf32>, vector<16x96xf32> -> vector<16x96xf32>
    %c0_3 = arith.constant 0 : index
    %c0_4 = arith.constant 0 : index
    %3 = vector.load %arg3[%c0_3, %c0_4] : memref<1x96xf32, #tpu.memory_space<vmem>>, vector<1x96xf32>
    %4 = vector.broadcast %3 : vector<1x96xf32> to vector<16x96xf32>
    %5 = arith.addf %2, %4 : vector<16x96xf32>
    %c0_5 = arith.constant 0 : index
    %c0_6 = arith.constant 0 : index
    %6 = vector.load %arg4[%c0_5, %c0_6] : memref<16x96xf32, #tpu.memory_space<vmem>>, vector<16x96xf32>
    tpu.vector_store %arg4[%c0_5, %c0_6], %5 {strides = array<i32>} : memref<16x96xf32, #tpu.memory_space<vmem>>, vector<16x96xf32>,
    return
  }
  func.func @transform_0(%arg0: i32) -> (i32, i32) {
    %c0_i32 = arith.constant 0 : i32
    %c0_i32_0 = arith.constant 0 : i32
    return %arg0, %c0_i32 : i32, i32
  }
  func.func @transform_1(%arg0: i32) -> (i32, i32) {
    %c0_i32 = arith.constant 0 : i32
    %c0_i32_0 = arith.constant 0 : i32
    %c0_i32_1 = arith.constant 0 : i32
    return %c0_i32, %c0_i32_0 : i32, i32
  }
  func.func @transform_2(%arg0: i32) -> (i32, i32) {
    %c0_i32 = arith.constant 0 : i32
    %c0_i32_0 = arith.constant 0 : i32
    %c0_i32_1 = arith.constant 0 : i32
    return %c0_i32, %c0_i32_0 : i32, i32
  }
  func.func @transform_3(%arg0: i32) -> (i32, i32) {
    %c0_i32 = arith.constant 0 : i32
    %c0_i32_0 = arith.constant 0 : i32
    return %arg0, %c0_i32 : i32, i32
  }
}

</mosaic_0001>

<bundles_post_ra>
// kernel: tpu_custom_call.1
= control target key start
LH: loop header
LB: loop body
LE: loop exit
PB: predicated region body
PF: predicated region fallthrough
CT: control target
= control target key end

     0   :  { %8 = vsyncpa [#allocation3], 0  ;;  %s337_s0 = inlined_call_operand.hbm [shape: f32[16,32], index: 0, kind: input, shape index: {}]   ;;  %s338_s1 = inlined_call_operand.hbm [shape: f32[32,96], index: 1, kind: input, shape index: {}]   ;;  %s339_s2 = inlined_call_operand.vmem [shape: f32[1,96], index: 2, kind: input, shape index: {}]   ;;  %s340_s3 = inlined_call_operand.hbm [shape: f32[16,96], index: 3, kind: output, shape index: {}]  }
   0x1   :  { %9 = vsyncpa [#allocation6], 0 }
   0x2   :  { %10 = vsyncpa [#allocation4], 0  ;;  %s264_s12 = smov [#allocation2]   ;;  %s192_s16 = scalar_lea.hbm %s337_s0, 256 }
   0x3   :  { %s16_s13 = sshll.u32 %s264_s12, 4  ;;  %p193_p0 = scmp.ne.s32.totalorder %s337_s0, %s192_s16  ;;  %s17_s13 = int_to_ptr.vmem [resolvable:$true] %s16_s13 }
   0x4   :  { %p196_p1 = scmp.lt.u32.totalorder %s192_s16, %s337_s0 }
   0x6   :  { %p198_p2 = pnand %p196_p1, %p193_p0 }
   0x8   :  { %201 = shalt.err (!%p198_p2)
}
   0x9   :  { %s202_s21 = scalar_lea.vmem %s17_s13, 256  ;;  %p207_p4 = scmp.lt.s32.totalorder %s17_s13, %s17_s13 }
   0xa   :  { %p203_p3 = scmp.ne.s32.totalorder %s17_s13, %s202_s21  ;;  %p208_p5 = scmp.lt.s32.totalorder %s202_s21, %s202_s21 }
   0xc   :  { %p209_p6 = por %p208_p5, %p207_p4 }
   0xe   :  { %p210_p7 = pnand %p209_p6, %p203_p3 }
  0x10   :  { %213 = shalt.err (!%p210_p7)
}
  0x11   :  { %s265_s22 = smov 128   ;;  %s266_s23 = smov 8  }
  0x12   :  { %22 = dma.hbm_to_vmem [thread:$0]  %s337_s0, 256, %s17_s13, [#allocation3], %s265_s22, %s265_s22, %s266_s23  }
  0x13   :  { %s267_s26 = smov [#allocation5]   ;;  %s214_s30 = scalar_lea.hbm %s338_s1, 512 }
  0x14   :  { %s28_s27 = sshll.u32 %s267_s26, 4  ;;  %p215_p8 = scmp.ne.s32.totalorder %s338_s1, %s214_s30  ;;  %s29_s27 = int_to_ptr.vmem [resolvable:$true] %s28_s27 }
  0x15   :  { %p218_p9 = scmp.lt.u32.totalorder %s214_s30, %s338_s1 }
  0x17   :  { %p220_p10 = pnand %p218_p9, %p215_p8 }
  0x19   :  { %223 = shalt.err (!%p220_p10)
}
  0x1a   :  { %s224_s8 = scalar_lea.vmem %s29_s27, 512  ;;  %p229_p12 = scmp.lt.s32.totalorder %s29_s27, %s29_s27 }
  0x1b   :  { %p225_p11 = scmp.ne.s32.totalorder %s29_s27, %s224_s8  ;;  %p230_p13 = scmp.lt.s32.totalorder %s224_s8, %s224_s8 }
  0x1d   :  { %p231_p0 = por %p230_p13, %p229_p12 }
  0x1f   :  { %p232_p1 = pnand %p231_p0, %p225_p11 }
  0x21   :  { %235 = shalt.err (!%p232_p1)
}
  0x22   :  { %34 = dma.hbm_to_vmem [thread:$0]  %s338_s1, 512, %s29_s27, [#allocation6], %s265_s22, %s265_s22, %s266_s23  }
  0x23   :  { %258 = dma.done.wait [#allocation3], 256  }
  0x24   :  { %259 = vsyncadd [#allocation3], 4294967040 }
  0x25   :  { %260 = dma.done.wait [#allocation6], 512  }
  0x26   :  { %261 = vsyncadd [#allocation6], 4294966784  ;;  %vm56_vm0 = vcmask 261120   ;;  %v45_v0 = vld [vmem:[#allocation5] sm:$0xff]  ;;  %v46_v1 = vld [vmem:[#allocation5 + $0x8] sm:$0xff]  ;;  %s268_s11 = smov [#allocation7]  }
  0x27   :  { %v47_v2 = vld [vmem:[#allocation5 + $0x10] sm:$0xff]  ;;  %v179_v3 = vpack.c.bf16 %v46_v1, %v45_v0  ;;  %v48_v4 = vld [vmem:[#allocation5 + $0x18] sm:$0xff]  ;;  %s146_s12 = sshll.u32 %s268_s11, 4  ;;  %vm138_vm1 = vcmask 785408   ;;  %s147_s12 = int_to_ptr.vmem [resolvable:$true] %s146_s12 }
  0x28   :  { %v43_v5 = vld [vmem:[#allocation2] sm:$0xff]  ;;  %v183_v6 = vpack.c.bf16 %v48_v4, %v47_v2  ;;  %v44_v7 = vld [vmem:[#allocation2 + $0x8] sm:$0xff]  ;;  %s236_s13 = scalar_lea.vmem %s147_s12, 256  ;;  %p241_p3 = scmp.lt.s32.totalorder %s147_s12, %s147_s12 }
  0x29   :  { %176 = vmatprep.mubr.msk.f32.mxu0 %vm56_vm0, %v43_v5  ;;  %180 = vmatprep.subr.bf16.mxu0 %v179_v3  ;;  %v159_v8 = vld [vmem:[%s339_s2] ss:$0 sm:$0xff]  ;;  %p237_p2 = scmp.ne.s32.totalorder %s147_s12, %s236_s13  ;;  %p242_p4 = scmp.lt.s32.totalorder %s236_s13, %s236_s13 }
  0x2a   :  { %182 = vmatpush3.bf16.msra.mxu0 %v179_v3 }
  0x2b   :  { %184 = vmatprep.subr.bf16.mxu0 %v183_v6  ;;  %p243_p5 = por %p242_p4, %p241_p3 }
  0x2d   :  { %p244_p6 = pnand %p243_p5, %p237_p2 }
  0x2e   :  { %186 = vmatpush3.bf16.msra.mxu0 %v183_v6 }
  0x31   :  { %177 = vmatmul.mubr.msk.f32.vlgmr.msra.gmra.mrb[0].mxu0 %vm56_vm0, %v44_v7 }
 0x104   :  { %v178_v9 = vpop.f32.mrb[0].mxu0 }
 0x105   :  { %v135_v10 = vadd.f32 %v178_v9, %v159_v8  ;;  %v129_v11 = vpop.f32.mrb[1].mxu0 }
 0x106   :  { %v130_v12 = vadd.f32 %v159_v8, %v129_v11 }
 0x107   :  { %140 = vst.msk [vmem:[#allocation7 + $0x8] sm:$0xff] %vm138_vm1, %v135_v10 }
 0x108   :  { %139 = vst.msk [vmem:[#allocation7] sm:$0xff] %vm138_vm1, %v130_v12 }
 0x109   :  { %247 = shalt.err (!%p244_p6)
}
 0x10a   :  { %s248_s2 = scalar_lea.hbm %s340_s3, 256 }
 0x10b   :  { %p249_p7 = scmp.ne.s32.totalorder %s340_s3, %s248_s2  ;;  %p252_p8 = scmp.lt.u32.totalorder %s248_s2, %s340_s3 }
 0x10d   :  { %p254_p9 = pnand %p252_p8, %p249_p7 }
 0x10f   :  { %257 = shalt.err (!%p254_p9)
}
 0x110   :  { %152 = dma.vmem_to_hbm [thread:$0]  %s147_s12, 256, %s340_s3, [#allocation4], %s265_s22, %s265_s22, %s266_s23  }
 0x111   :  { %262 = dma.done.wait [#allocation4], 256  }
 0x112   :  { %263 = vsyncadd [#allocation4], 4294967040 }
 0x113   :  { %156 = vsyncpa [#allocation3], 1 }
 0x114   :  { %157 = vsyncpa [#allocation6], 1 }
 0x115   :  { %158 = vsyncpa [#allocation4], 1 }

</bundles_post_ra>
